<compile_context>
chip_gen: v7x
topology: tpu7x:2x2x1
jax: 0.10.0
libtpu: 0.0.40
codegen_flags: <defaults>
</compile_context>

<pallas_src>
import functools

import jax
import jax.numpy as jnp
from jax.experimental import pallas as pl
from jax.experimental.pallas import tpu as pltpu

EPS = 1e-5


# --------------------------------------------------------------------------- #
# Kernel: one (Linear -> BatchNorm1d -> optional ReLU) layer, one feature tile.
# x is the full resident (N, K) batch slab; w is a streamed (K, tf) tile;
# p packs (bias, gamma, beta) as rows of a (3, tf) tile.
# --------------------------------------------------------------------------- #
def _layer_kernel(x_ref, w_ref, p_ref, o_ref, *, relu):
    # bf16 x bf16 -> f32 accumulation on the MXU; W is already (in, out): no .T.
    y = jnp.dot(x_ref[...], w_ref[...], preferred_element_type=jnp.float32)
    y = y + p_ref[0:1, :]                                  # Linear bias
    # BatchNorm1d (training mode): per-feature stats over the full batch,
    # which is entirely resident in this block -> feature tiling is exact.
    mean = jnp.mean(y, axis=0, keepdims=True)
    var = jnp.mean((y - mean) * (y - mean), axis=0, keepdims=True)
    scale = p_ref[1:2, :] * jax.lax.rsqrt(var + EPS)       # fold gamma into scale
    y = (y - mean) * scale + p_ref[2:3, :]                 # beta
    if relu:
        y = jnp.maximum(y, 0.0)
    o_ref[...] = y.astype(o_ref.dtype)


# --------------------------------------------------------------------------- #
# Tiling / VMEM budgeting helpers.
# --------------------------------------------------------------------------- #
def _vmem_cap_bytes():
    """~75% of physical VMEM (64 MiB v7x, 128 MiB v5e/v6e); safe fallback."""
    phys = 64 << 20
    try:
        info = pltpu.get_tpu_info()
        phys = int(getattr(info, "vmem_capacity_bytes", phys))
    except Exception:
        pass
    return (phys * 3) // 4


def _pick_tf(fdim, target):
    """Largest multiple of 128 dividing fdim and <= target (else full fdim),
    but keep >= 2 feature tiles when possible so v7x's dual TC is used."""
    if fdim % 128 != 0:
        return fdim
    t = min(fdim, max(128, target - target % 128))
    t -= t % 128
    while fdim % t != 0:
        t -= 128
    if fdim // t < 2 and fdim >= 256:
        half = (fdim // 2) - ((fdim // 2) % 128)
        while half >= 128 and fdim % half != 0:
            half -= 128
        if half >= 128:
            t = half
    return t


def _resident_bytes(n, kdim, tf, out_bytes):
    """Conservative resident-VMEM estimate (double-buffered blocks)."""
    return (2 * n * kdim * 2          # x slab (bf16) — conservatively x2
            + 2 * kdim * tf * 2       # streamed weight tile (bf16), double-buffered
            + 2 * 8 * tf * 4          # packed bias/gamma/beta tile (sublane-padded)
            + 2 * n * tf * out_bytes)  # output tile, double-buffered


# --------------------------------------------------------------------------- #
# One layer: y = BN(x @ w_t + b) [-> ReLU].  w_t is (in, out) bf16 (pre-prepped).
# --------------------------------------------------------------------------- #
def _linear_bn(x, w_t, bn_pack, *, relu, out_dtype, tf_target=512):
    n, kdim = x.shape
    kdim2, fdim = w_t.shape
    assert kdim == kdim2, (kdim, kdim2)
    assert bn_pack.shape == (3, fdim), bn_pack.shape

    out_bytes = jnp.dtype(out_dtype).itemsize
    cap = _vmem_cap_bytes()

    tf = _pick_tf(fdim, tf_target)
    # Shrink the feature tile if the resident footprint would blow the budget.
    while _resident_bytes(n, kdim, tf, out_bytes) > cap and tf > 128:
        nt = tf - 128
        while nt >= 128 and fdim % nt != 0:
            nt -= 128
        if nt < 128:
            break
        tf = nt
    resident = _resident_bytes(n, kdim, tf, out_bytes)
    assert resident <= cap, (
        f"resident VMEM footprint {resident} B exceeds budget {cap} B; "
        "batch/feature dims too large for the no-K-tiling path")
    vmem_limit = int(min(cap, max(8 << 20, 2 * resident)))

    grid = (fdim // tf,)
    kernel = functools.partial(_layer_kernel, relu=relu)
    return pl.pallas_call(
        kernel,
        out_shape=jax.ShapeDtypeStruct((n, fdim), out_dtype),
        grid_spec=pltpu.PrefetchScalarGridSpec(
            num_scalar_prefetch=0,
            grid=grid,
            in_specs=[
                # Full batch slab, constant block index -> fetched once, resident.
                pl.BlockSpec((n, kdim), lambda f: (0, 0)),
                # Weight tiles streamed feature-tile by feature-tile.
                pl.BlockSpec((kdim, tf), lambda f: (0, f)),
                # Packed (bias, gamma, beta) rows for this feature tile.
                pl.BlockSpec((3, tf), lambda f: (0, f)),
            ],
            out_specs=pl.BlockSpec((n, tf), lambda f: (0, f)),
        ),
        compiler_params=pltpu.CompilerParams(
            dimension_semantics=("parallel",),
            vmem_limit_bytes=vmem_limit,
        ),
    )(x, w_t, bn_pack)


# --------------------------------------------------------------------------- #
# Parameter prep (ONE-TIME): transpose + bf16-cast weights, pack BN params.
# --------------------------------------------------------------------------- #
def prepare_params(params):
    def prep(w, b, g, be):
        w_t = jnp.asarray(w).T.astype(jnp.bfloat16)            # (in, out) bf16
        pk = jnp.concatenate([jnp.reshape(b, (1, -1)),
                              jnp.reshape(g, (1, -1)),
                              jnp.reshape(be, (1, -1))], axis=0).astype(jnp.float32)
        return w_t, pk

    out = {}
    for i in (1, 2, 3):
        w_t, pk = prep(params[f"w{i}"], params[f"b{i}"],
                       params[f"g{i}"], params[f"be{i}"])
        out[f"w{i}t"] = w_t
        out[f"p{i}"] = pk
    return out


def projection_mlp(x, prepared, num_layers=3, tf_target=512):
    """x: (N, in_dim) float32; prepared: output of prepare_params()."""
    assert x.ndim == 2 and x.shape[0] >= 2, \
        "BatchNorm1d training-mode stats need batch size >= 2"
    layer = functools.partial(_linear_bn, tf_target=tf_target)
    h = x.astype(jnp.bfloat16)
    if num_layers == 3:
        h = layer(h, prepared["w1t"], prepared["p1"], relu=True, out_dtype=jnp.bfloat16)
        h = layer(h, prepared["w2t"], prepared["p2"], relu=True, out_dtype=jnp.bfloat16)
        h = layer(h, prepared["w3t"], prepared["p3"], relu=False, out_dtype=jnp.float32)
    elif num_layers == 2:
        h = layer(h, prepared["w1t"], prepared["p1"], relu=True, out_dtype=jnp.bfloat16)
        h = layer(h, prepared["w3t"], prepared["p3"], relu=False, out_dtype=jnp.float32)
    else:
        raise ValueError("num_layers must be 2 or 3")
    return h


# --------------------------------------------------------------------------- #
# Synthetic init (torch layout) + pure-JAX references.
# --------------------------------------------------------------------------- #
def init_params(key, in_dim, hidden_dim, out_dim):
    ks = jax.random.split(key, 6)

    def lin(kw, kb, fan_in, fan_out):
        bound = 1.0 / (fan_in ** 0.5)
        w = jax.random.uniform(kw, (fan_out, fan_in), jnp.float32, -bound, bound)
        b = jax.random.uniform(kb, (1, fan_out), jnp.float32, -bound, bound)
        return w, b

    w1, b1 = lin(ks[0], ks[1], in_dim, hidden_dim)
    w2, b2 = lin(ks[2], ks[3], hidden_dim, hidden_dim)
    w3, b3 = lin(ks[4], ks[5], hidden_dim, out_dim)
    ones = lambda f: jnp.ones((1, f), jnp.float32)
    zeros = lambda f: jnp.zeros((1, f), jnp.float32)
    return dict(
        w1=w1, b1=b1, g1=ones(hidden_dim), be1=zeros(hidden_dim),
        w2=w2, b2=b2, g2=ones(hidden_dim), be2=zeros(hidden_dim),
        w3=w3, b3=b3, g3=ones(out_dim), be3=zeros(out_dim),
    )


def _layer_ref(h, w, b, g, be, relu, matmul_bf16):
    if matmul_bf16:
        y = jnp.dot(h.astype(jnp.bfloat16), w.T.astype(jnp.bfloat16),
                    preferred_element_type=jnp.float32) + b
    else:
        y = h @ w.T + b
    m = jnp.mean(y, axis=0, keepdims=True)
    v = jnp.mean((y - m) ** 2, axis=0, keepdims=True)
    y = (y - m) * (g * jax.lax.rsqrt(v + EPS)) + be
    return jnp.maximum(y, 0.0) if relu else y


def reference(x, p, matmul_bf16=True):
    """matmul_bf16=True mirrors the kernel's precision (bf16 MXU operands,
    f32 accumulation/BN); False is the pure-f32 PyTorch-equivalent forward."""
    cast = (lambda a: a.astype(jnp.bfloat16)) if matmul_bf16 else (lambda a: a)
    h = cast(_layer_ref(x, p["w1"], p["b1"], p["g1"], p["be1"], True, matmul_bf16))
    h = cast(_layer_ref(h, p["w2"], p["b2"], p["g2"], p["be2"], True, matmul_bf16))
    h = _layer_ref(h, p["w3"], p["b3"], p["g3"], p["be3"], False, matmul_bf16)
    return h


if __name__ == "__main__":
    key = jax.random.PRNGKey(0)
    k_x, k_p = jax.random.split(key)

    # Small, TPU-friendly shapes: batch multiple of 8, features multiples of 128
    # (lane-dense output stores).  Production SimSiam dims would be 2048-wide.
    batch, in_dim, hidden_dim, out_dim = 16, 128, 256, 256
    x = jax.random.normal(k_x, (batch, in_dim), jnp.float32)
    params = init_params(k_p, in_dim, hidden_dim, out_dim)

    # One-time weight prep (transpose + bf16 cast + BN packing) kept OUT of the
    # forward pass so XLA does not re-materialize it every call.
    prepared = prepare_params(params)

    # Small tf_target so the test exercises the multi-feature-tile grid path;
    # production dims (2048) use the default tf_target=512 (4 parallel tiles).
    fwd = jax.jit(lambda xx, pp: projection_mlp(xx, pp, num_layers=3, tf_target=128))
    out = jax.block_until_ready(fwd(x, prepared))
    assert out.shape == (batch, out_dim)
    assert out.dtype == jnp.float32

    # Precision-matched reference (bf16 matmul operands, f32 BN) -> tight check.
    ref_bf = reference(x, params, matmul_bf16=True)
    assert jnp.allclose(out, ref_bf, atol=5e-3, rtol=5e-3), (
        "mismatch vs bf16-matmul reference, max err "
        f"{float(jnp.max(jnp.abs(out - ref_bf)))}")

    # Pure-f32 (PyTorch-semantics) reference -> loose sanity check of semantics.
    ref_f32 = reference(x, params, matmul_bf16=False)
    assert jnp.allclose(out, ref_f32, atol=1e-1, rtol=1e-1), (
        "mismatch vs f32 reference, max err "
        f"{float(jnp.max(jnp.abs(out - ref_f32)))}")

    # Exercise the num_layers=2 branch (set_layers(2)) as well.
    out2 = jax.block_until_ready(
        jax.jit(lambda xx, pp: projection_mlp(xx, pp, num_layers=2, tf_target=128))(x, prepared))
    assert out2.shape == (batch, out_dim) and out2.dtype == jnp.float32

    print("KERNEL_OK")
</pallas_src>

<mosaic_0001>
module attributes {stable_mosaic.version = 11 : i64} {
  func.func @_layer_kernel(%arg0: i32, %arg1: memref<16x256xbf16, #tpu.memory_space<vmem>>, %arg2: memref<256x128xbf16, #tpu.memory_space<vmem>>, %arg3: memref<3x128xf32, #tpu.memory_space<vmem>>, %arg4: memref<16x128xbf16, #tpu.memory_space<vmem>>) attributes {dimension_semantics = [#tpu.dimension_semantics<parallel>], iteration_bounds = array<i64: 2>, scalar_prefetch = 0 : i64, scratch_operands = 0 : i64, tpu.core_type = #tpu.core_type<tc>, window_params = [{pipeline_mode = #tpu.pipeline_mode<synchronous>, transform_indices = @transform_0, window_bounds = array<i64: 16, 256>}, {transform_indices = @transform_1, window_bounds = array<i64: 256, 128>}, {transform_indices = @transform_2, window_bounds = array<i64: 3, 128>}, {transform_indices = @transform_3, window_bounds = array<i64: 16, 128>}]} {
    %c0 = arith.constant 0 : index
    %c0_0 = arith.constant 0 : index
    %0 = vector.load %arg1[%c0, %c0_0] : memref<16x256xbf16, #tpu.memory_space<vmem>>, vector<16x256xbf16>
    %c0_1 = arith.constant 0 : index
    %c0_2 = arith.constant 0 : index
    %1 = vector.load %arg2[%c0_1, %c0_2] : memref<256x128xbf16, #tpu.memory_space<vmem>>, vector<256x128xbf16>
    %cst = arith.constant dense<0.000000e+00> : vector<16x128xf32>
    %2 = tpu.matmul %0, %1, %cst {dimension_numbers = #tpu.dot_dimension_numbers<[1], [0], [0], [1], [0, 0, 1, 1], [], []>} : vector<16x256xbf16>, vector<256x128xbf16>, vector<16x128xf32> -> vector<16x128xf32>
    %c0_3 = arith.constant 0 : index
    %c0_4 = arith.constant 0 : index
    %3 = vector.load %arg3[%c0_3, %c0_4] : memref<3x128xf32, #tpu.memory_space<vmem>>, vector<1x128xf32>
    %4 = vector.broadcast %3 : vector<1x128xf32> to vector<16x128xf32>
    %5 = arith.addf %2, %4 : vector<16x128xf32>
    %cst_5 = arith.constant dense<0.000000e+00> : vector<128xf32>
    %6 = vector.multi_reduction <add>, %5, %cst_5 [0] : vector<16x128xf32> to vector<128xf32>
    %7 = vector.shape_cast %6 : vector<128xf32> to vector<1x128xf32>
    %cst_6 = arith.constant 1.600000e+01 : f32
    %8 = vector.broadcast %cst_6 : f32 to vector<1x128xf32>
    %9 = arith.divf %7, %8 : vector<1x128xf32>
    %10 = vector.broadcast %9 : vector<1x128xf32> to vector<16x128xf32>
    %11 = arith.subf %5, %10 : vector<16x128xf32>
    %12 = vector.broadcast %9 : vector<1x128xf32> to vector<16x128xf32>
    %13 = arith.subf %5, %12 : vector<16x128xf32>
    %14 = arith.mulf %11, %13 : vector<16x128xf32>
    %cst_7 = arith.constant dense<0.000000e+00> : vector<128xf32>
    %15 = vector.multi_reduction <add>, %14, %cst_7 [0] : vector<16x128xf32> to vector<128xf32>
    %16 = vector.shape_cast %15 : vector<128xf32> to vector<1x128xf32>
    %cst_8 = arith.constant 1.600000e+01 : f32
    %17 = vector.broadcast %cst_8 : f32 to vector<1x128xf32>
    %18 = arith.divf %16, %17 : vector<1x128xf32>
    %c1 = arith.constant 1 : index
    %c0_9 = arith.constant 0 : index
    %19 = vector.load %arg3[%c1, %c0_9] : memref<3x128xf32, #tpu.memory_space<vmem>>, vector<1x128xf32>
    %cst_10 = arith.constant 9.99999974E-6 : f32
    %20 = vector.broadcast %cst_10 : f32 to vector<1x128xf32>
    %21 = arith.addf %18, %20 : vector<1x128xf32>
    %22 = math.rsqrt %21 : vector<1x128xf32>
    %23 = arith.mulf %19, %22 : vector<1x128xf32>
    %24 = vector.broadcast %9 : vector<1x128xf32> to vector<16x128xf32>
    %25 = arith.subf %5, %24 : vector<16x128xf32>
    %26 = vector.broadcast %23 : vector<1x128xf32> to vector<16x128xf32>
    %27 = arith.mulf %25, %26 : vector<16x128xf32>
    %c2 = arith.constant 2 : index
    %c0_11 = arith.constant 0 : index
    %28 = vector.load %arg3[%c2, %c0_11] : memref<3x128xf32, #tpu.memory_space<vmem>>, vector<1x128xf32>
    %29 = vector.broadcast %28 : vector<1x128xf32> to vector<16x128xf32>
    %30 = arith.addf %27, %29 : vector<16x128xf32>
    %cst_12 = arith.constant 0.000000e+00 : f32
    %31 = vector.broadcast %cst_12 : f32 to vector<16x128xf32>
    %32 = arith.maximumf %30, %31 : vector<16x128xf32>
    %33 = arith.truncf %32 : vector<16x128xf32> to vector<16x128xbf16>
    %c0_13 = arith.constant 0 : index
    %c0_14 = arith.constant 0 : index
    %34 = vector.load %arg4[%c0_13, %c0_14] : memref<16x128xbf16, #tpu.memory_space<vmem>>, vector<16x128xbf16>
    tpu.vector_store %arg4[%c0_13, %c0_14], %33 {strides = array<i32>} : memref<16x128xbf16, #tpu.memory_space<vmem>>, vector<16x128xbf16>,
    return
  }
  func.func @transform_0(%arg0: i32) -> (i32, i32) {
    %c0_i32 = arith.constant 0 : i32
    %c0_i32_0 = arith.constant 0 : i32
    %c0_i32_1 = arith.constant 0 : i32
    return %c0_i32, %c0_i32_0 : i32, i32
  }
  func.func @transform_1(%arg0: i32) -> (i32, i32) {
    %c0_i32 = arith.constant 0 : i32
    %c0_i32_0 = arith.constant 0 : i32
    return %c0_i32, %arg0 : i32, i32
  }
  func.func @transform_2(%arg0: i32) -> (i32, i32) {
    %c0_i32 = arith.constant 0 : i32
    %c0_i32_0 = arith.constant 0 : i32
    return %c0_i32, %arg0 : i32, i32
  }
  func.func @transform_3(%arg0: i32) -> (i32, i32) {
    %c0_i32 = arith.constant 0 : i32
    %c0_i32_0 = arith.constant 0 : i32
    return %c0_i32, %arg0 : i32, i32
  }
}

module attributes {stable_mosaic.version = 11 : i64} {
  func.func @_layer_kernel(%arg0: i32, %arg1: memref<16x128xbf16, #tpu.memory_space<vmem>>, %arg2: memref<128x128xbf16, #tpu.memory_space<vmem>>, %arg3: memref<3x128xf32, #tpu.memory_space<vmem>>, %arg4: memref<16x128xbf16, #tpu.memory_space<vmem>>) attributes {dimension_semantics = [#tpu.dimension_semantics<parallel>], iteration_bounds = array<i64: 2>, scalar_prefetch = 0 : i64, scratch_operands = 0 : i64, tpu.core_type = #tpu.core_type<tc>, window_params = [{pipeline_mode = #tpu.pipeline_mode<synchronous>, transform_indices = @transform_0, window_bounds = array<i64: 16, 128>}, {transform_indices = @transform_1, window_bounds = array<i64: 128, 128>}, {transform_indices = @transform_2, window_bounds = array<i64: 3, 128>}, {transform_indices = @transform_3, window_bounds = array<i64: 16, 128>}]} {
    %c0 = arith.constant 0 : index
    %c0_0 = arith.constant 0 : index
    %0 = vector.load %arg1[%c0, %c0_0] : memref<16x128xbf16, #tpu.memory_space<vmem>>, vector<16x128xbf16>
    %c0_1 = arith.constant 0 : index
    %c0_2 = arith.constant 0 : index
    %1 = vector.load %arg2[%c0_1, %c0_2] : memref<128x128xbf16, #tpu.memory_space<vmem>>, vector<128x128xbf16>
    %cst = arith.constant dense<0.000000e+00> : vector<16x128xf32>
    %2 = tpu.matmul %0, %1, %cst {dimension_numbers = #tpu.dot_dimension_numbers<[1], [0], [0], [1], [0, 0, 1, 1], [], []>} : vector<16x128xbf16>, vector<128x128xbf16>, vector<16x128xf32> -> vector<16x128xf32>
    %c0_3 = arith.constant 0 : index
    %c0_4 = arith.constant 0 : index
    %3 = vector.load %arg3[%c0_3, %c0_4] : memref<3x128xf32, #tpu.memory_space<vmem>>, vector<1x128xf32>
    %4 = vector.broadcast %3 : vector<1x128xf32> to vector<16x128xf32>
    %5 = arith.addf %2, %4 : vector<16x128xf32>
    %cst_5 = arith.constant dense<0.000000e+00> : vector<128xf32>
    %6 = vector.multi_reduction <add>, %5, %cst_5 [0] : vector<16x128xf32> to vector<128xf32>
    %7 = vector.shape_cast %6 : vector<128xf32> to vector<1x128xf32>
    %cst_6 = arith.constant 1.600000e+01 : f32
    %8 = vector.broadcast %cst_6 : f32 to vector<1x128xf32>
    %9 = arith.divf %7, %8 : vector<1x128xf32>
    %10 = vector.broadcast %9 : vector<1x128xf32> to vector<16x128xf32>
    %11 = arith.subf %5, %10 : vector<16x128xf32>
    %12 = vector.broadcast %9 : vector<1x128xf32> to vector<16x128xf32>
    %13 = arith.subf %5, %12 : vector<16x128xf32>
    %14 = arith.mulf %11, %13 : vector<16x128xf32>
    %cst_7 = arith.constant dense<0.000000e+00> : vector<128xf32>
    %15 = vector.multi_reduction <add>, %14, %cst_7 [0] : vector<16x128xf32> to vector<128xf32>
    %16 = vector.shape_cast %15 : vector<128xf32> to vector<1x128xf32>
    %cst_8 = arith.constant 1.600000e+01 : f32
    %17 = vector.broadcast %cst_8 : f32 to vector<1x128xf32>
    %18 = arith.divf %16, %17 : vector<1x128xf32>
    %c1 = arith.constant 1 : index
    %c0_9 = arith.constant 0 : index
    %19 = vector.load %arg3[%c1, %c0_9] : memref<3x128xf32, #tpu.memory_space<vmem>>, vector<1x128xf32>
    %cst_10 = arith.constant 9.99999974E-6 : f32
    %20 = vector.broadcast %cst_10 : f32 to vector<1x128xf32>
    %21 = arith.addf %18, %20 : vector<1x128xf32>
    %22 = math.rsqrt %21 : vector<1x128xf32>
    %23 = arith.mulf %19, %22 : vector<1x128xf32>
    %24 = vector.broadcast %9 : vector<1x128xf32> to vector<16x128xf32>
    %25 = arith.subf %5, %24 : vector<16x128xf32>
    %26 = vector.broadcast %23 : vector<1x128xf32> to vector<16x128xf32>
    %27 = arith.mulf %25, %26 : vector<16x128xf32>
    %c2 = arith.constant 2 : index
    %c0_11 = arith.constant 0 : index
    %28 = vector.load %arg3[%c2, %c0_11] : memref<3x128xf32, #tpu.memory_space<vmem>>, vector<1x128xf32>
    %29 = vector.broadcast %28 : vector<1x128xf32> to vector<16x128xf32>
    %30 = arith.addf %27, %29 : vector<16x128xf32>
    %cst_12 = arith.constant 0.000000e+00 : f32
    %31 = vector.broadcast %cst_12 : f32 to vector<16x128xf32>
    %32 = arith.maximumf %30, %31 : vector<16x128xf32>
    %33 = arith.truncf %32 : vector<16x128xf32> to vector<16x128xbf16>
    %c0_13 = arith.constant 0 : index
    %c0_14 = arith.constant 0 : index
    %34 = vector.load %arg4[%c0_13, %c0_14] : memref<16x128xbf16, #tpu.memory_space<vmem>>, vector<16x128xbf16>
    tpu.vector_store %arg4[%c0_13, %c0_14], %33 {strides = array<i32>} : memref<16x128xbf16, #tpu.memory_space<vmem>>, vector<16x128xbf16>,
    return
  }
  func.func @transform_0(%arg0: i32) -> (i32, i32) {
    %c0_i32 = arith.constant 0 : i32
    %c0_i32_0 = arith.constant 0 : i32
    %c0_i32_1 = arith.constant 0 : i32
    return %c0_i32, %c0_i32_0 : i32, i32
  }
  func.func @transform_1(%arg0: i32) -> (i32, i32) {
    %c0_i32 = arith.constant 0 : i32
    %c0_i32_0 = arith.constant 0 : i32
    return %c0_i32, %arg0 : i32, i32
  }
  func.func @transform_2(%arg0: i32) -> (i32, i32) {
    %c0_i32 = arith.constant 0 : i32
    %c0_i32_0 = arith.constant 0 : i32
    return %c0_i32, %arg0 : i32, i32
  }
  func.func @transform_3(%arg0: i32) -> (i32, i32) {
    %c0_i32 = arith.constant 0 : i32
    %c0_i32_0 = arith.constant 0 : i32
    return %c0_i32, %arg0 : i32, i32
  }
}

module attributes {stable_mosaic.version = 11 : i64} {
  func.func @_layer_kernel(%arg0: i32, %arg1: memref<16x256xbf16, #tpu.memory_space<vmem>>, %arg2: memref<256x128xbf16, #tpu.memory_space<vmem>>, %arg3: memref<3x128xf32, #tpu.memory_space<vmem>>, %arg4: memref<16x128xf32, #tpu.memory_space<vmem>>) attributes {dimension_semantics = [#tpu.dimension_semantics<parallel>], iteration_bounds = array<i64: 2>, scalar_prefetch = 0 : i64, scratch_operands = 0 : i64, tpu.core_type = #tpu.core_type<tc>, window_params = [{pipeline_mode = #tpu.pipeline_mode<synchronous>, transform_indices = @transform_0, window_bounds = array<i64: 16, 256>}, {transform_indices = @transform_1, window_bounds = array<i64: 256, 128>}, {transform_indices = @transform_2, window_bounds = array<i64: 3, 128>}, {transform_indices = @transform_3, window_bounds = array<i64: 16, 128>}]} {
    %c0 = arith.constant 0 : index
    %c0_0 = arith.constant 0 : index
    %0 = vector.load %arg1[%c0, %c0_0] : memref<16x256xbf16, #tpu.memory_space<vmem>>, vector<16x256xbf16>
    %c0_1 = arith.constant 0 : index
    %c0_2 = arith.constant 0 : index
    %1 = vector.load %arg2[%c0_1, %c0_2] : memref<256x128xbf16, #tpu.memory_space<vmem>>, vector<256x128xbf16>
    %cst = arith.constant dense<0.000000e+00> : vector<16x128xf32>
    %2 = tpu.matmul %0, %1, %cst {dimension_numbers = #tpu.dot_dimension_numbers<[1], [0], [0], [1], [0, 0, 1, 1], [], []>} : vector<16x256xbf16>, vector<256x128xbf16>, vector<16x128xf32> -> vector<16x128xf32>
    %c0_3 = arith.constant 0 : index
    %c0_4 = arith.constant 0 : index
    %3 = vector.load %arg3[%c0_3, %c0_4] : memref<3x128xf32, #tpu.memory_space<vmem>>, vector<1x128xf32>
    %4 = vector.broadcast %3 : vector<1x128xf32> to vector<16x128xf32>
    %5 = arith.addf %2, %4 : vector<16x128xf32>
    %cst_5 = arith.constant dense<0.000000e+00> : vector<128xf32>
    %6 = vector.multi_reduction <add>, %5, %cst_5 [0] : vector<16x128xf32> to vector<128xf32>
    %7 = vector.shape_cast %6 : vector<128xf32> to vector<1x128xf32>
    %cst_6 = arith.constant 1.600000e+01 : f32
    %8 = vector.broadcast %cst_6 : f32 to vector<1x128xf32>
    %9 = arith.divf %7, %8 : vector<1x128xf32>
    %10 = vector.broadcast %9 : vector<1x128xf32> to vector<16x128xf32>
    %11 = arith.subf %5, %10 : vector<16x128xf32>
    %12 = vector.broadcast %9 : vector<1x128xf32> to vector<16x128xf32>
    %13 = arith.subf %5, %12 : vector<16x128xf32>
    %14 = arith.mulf %11, %13 : vector<16x128xf32>
    %cst_7 = arith.constant dense<0.000000e+00> : vector<128xf32>
    %15 = vector.multi_reduction <add>, %14, %cst_7 [0] : vector<16x128xf32> to vector<128xf32>
    %16 = vector.shape_cast %15 : vector<128xf32> to vector<1x128xf32>
    %cst_8 = arith.constant 1.600000e+01 : f32
    %17 = vector.broadcast %cst_8 : f32 to vector<1x128xf32>
    %18 = arith.divf %16, %17 : vector<1x128xf32>
    %c1 = arith.constant 1 : index
    %c0_9 = arith.constant 0 : index
    %19 = vector.load %arg3[%c1, %c0_9] : memref<3x128xf32, #tpu.memory_space<vmem>>, vector<1x128xf32>
    %cst_10 = arith.constant 9.99999974E-6 : f32
    %20 = vector.broadcast %cst_10 : f32 to vector<1x128xf32>
    %21 = arith.addf %18, %20 : vector<1x128xf32>
    %22 = math.rsqrt %21 : vector<1x128xf32>
    %23 = arith.mulf %19, %22 : vector<1x128xf32>
    %24 = vector.broadcast %9 : vector<1x128xf32> to vector<16x128xf32>
    %25 = arith.subf %5, %24 : vector<16x128xf32>
    %26 = vector.broadcast %23 : vector<1x128xf32> to vector<16x128xf32>
    %27 = arith.mulf %25, %26 : vector<16x128xf32>
    %c2 = arith.constant 2 : index
    %c0_11 = arith.constant 0 : index
    %28 = vector.load %arg3[%c2, %c0_11] : memref<3x128xf32, #tpu.memory_space<vmem>>, vector<1x128xf32>
    %29 = vector.broadcast %28 : vector<1x128xf32> to vector<16x128xf32>
    %30 = arith.addf %27, %29 : vector<16x128xf32>
    %c0_12 = arith.constant 0 : index
    %c0_13 = arith.constant 0 : index
    %31 = vector.load %arg4[%c0_12, %c0_13] : memref<16x128xf32, #tpu.memory_space<vmem>>, vector<16x128xf32>
    tpu.vector_store %arg4[%c0_12, %c0_13], %30 {strides = array<i32>} : memref<16x128xf32, #tpu.memory_space<vmem>>, vector<16x128xf32>,
    return
  }
  func.func @transform_0(%arg0: i32) -> (i32, i32) {
    %c0_i32 = arith.constant 0 : i32
    %c0_i32_0 = arith.constant 0 : i32
    %c0_i32_1 = arith.constant 0 : i32
    return %c0_i32, %c0_i32_0 : i32, i32
  }
  func.func @transform_1(%arg0: i32) -> (i32, i32) {
    %c0_i32 = arith.constant 0 : i32
    %c0_i32_0 = arith.constant 0 : i32
    return %c0_i32, %arg0 : i32, i32
  }
  func.func @transform_2(%arg0: i32) -> (i32, i32) {
    %c0_i32 = arith.constant 0 : i32
    %c0_i32_0 = arith.constant 0 : i32
    return %c0_i32, %arg0 : i32, i32
  }
  func.func @transform_3(%arg0: i32) -> (i32, i32) {
    %c0_i32 = arith.constant 0 : i32
    %c0_i32_0 = arith.constant 0 : i32
    return %c0_i32, %arg0 : i32, i32
  }
}

</mosaic_0001>

<bundles_post_ra>
// kernel: _lambda_.3
= control target key start
LH: loop header
LB: loop body
LE: loop exit
PB: predicated region body
PF: predicated region fallthrough
CT: control target
= control target key end

     0   :  { %8 = vsyncpa [#allocation3], 0  ;;  %s964_s0 = inlined_call_operand.vmem [shape: bf16[16,128], index: 0, kind: input, shape index: {}]   ;;  %s965_s1 = inlined_call_operand.hbm [shape: bf16[128,256], index: 1, kind: input, shape index: {}]   ;;  %s966_s2 = inlined_call_operand.hbm [shape: f32[3,256], index: 2, kind: input, shape index: {}]   ;;  %s967_s3 = inlined_call_operand.vmem [shape: bf16[16,256], index: 3, kind: output, shape index: {}]  }
   0x1   :  { %10 = vsyncpa [#allocation3 + $0x1], 0 }
   0x2   :  { %11 = vsyncpa [#allocation5], 0 }
   0x3   :  { %13 = vsyncpa [#allocation5 + $0x1], 0  ;;  %s778_s12 = smov 0   ;;  %s780_s13 = smov 0  }
   0x4   :  { %s782_s14 = smov 0   ;;  %s784_s15 = smov 0  }
   0x5 LB: > { %s797_s16 = sadd.s32 4294967295, %s749_s15   ;;  %s800_s17 = sadd.s32 1, %s749_s15   ;;  %s749_s15 = sphi %s784_s15, %s980_s15   ;;  %s745_s14 = sphi %s782_s14, %s979_s14   ;;  %s741_s13 = sphi %s780_s13, %s978_s13   ;;  %s737_s12 = sphi %s778_s12, %s977_s12  }
   0x6   : > { %s44_s18 = ssub.s32 %s749_s15, %s800_s17  ;;  %s47_s19 = sadd.s32 1, %s745_s14 }
   0x7   : > { %p45_p0 = scmp.eq.s32.totalorder %s44_s18, 0  ;;  %p54_p1 = scmp.ne.s32.totalorder %s745_s14, %s741_s13 }
   0x8   : > { %p55_p2 = scmp.eq.s32.totalorder %s749_s15, 0  ;;  %p60_p3 = scmp.ne.s32.totalorder %s741_s13, %s737_s12 }
   0x9   : > { %s810_s20 = scalar_select %p45_p0, %s745_s14, %s47_s19  }
   0xa   : > { %p812_p4 = por %p55_p2, %p54_p1  ;;  %p61_p5 = scmp.eq.s32.totalorder %s797_s16, 0 }
   0xb   : > { %p110_p6 = scmp.eq.s32.totalorder %s797_s16, 1  ;;  %p602_p8 = scmp.lt.s32.totalorder %s749_s15, 2 }
   0xc   : > { %p818_p7 = por %p61_p5, %p60_p3  ;;  %s828_s24 = sand.u32 1, %s745_s14  }
   0xd   : > { %p823_p9 = por %p110_p6, %p54_p1  ;;  %s530_s25 = sshll.u32 %s828_s24, 6 }
   0xe   : > { %s970_s22 = scalar_select %p818_p7, 1, 0 }
   0xf   : > { %s971_s23 = scalar_select %p823_p9, 1, 0 }
  0x10   : > { %s531_s26 = sshll.u32 %s749_s15, 6  ;;  %s143_s30 = scalar_lea.vmem [#allocation2], %s530_s25 }
  0x11   : > { %s837_s29 = scalar_lea.hbm %s965_s1, %s531_s26  ;;  %s149_s4 = sshll.u32 %s143_s30, 4  ;;  %s839_s4 = int_to_ptr.vmem [resolvable:$true] %s149_s4 }
  0x12   : > { %p843_p10 = pnand %p602_p8, %p812_p4  ;;  %s140_s6 = scalar_lea.sflag [#allocation3], %s828_s24 }
  0x13   : > { %s651_s7 = scalar_lea.hbm %s837_s29, 1024  ;;  %s656_s10 = scalar_lea.hbm %s965_s1, 2048 }
  0x14   : > { %p652_p11 = scmp.ne.s32.totalorder %s837_s29, %s651_s7  ;;  %p653_p12 = pneg %p843_p10 }
  0x15   : > { %p657_p1 = scmp.lt.u32.totalorder %s837_s29, %s965_s1  ;;  %p658_p2 = scmp.lt.u32.totalorder %s656_s10, %s651_s7 }
  0x16   : > { %p654_p13 = pnand %p653_p12, %p652_p11  ;;  %p660_p4 = scmp.lt.u32.totalorder %s651_s7, %s837_s29 }
  0x17   : > { %p659_p3 = por %p658_p2, %p657_p1 }
  0x18   : > { %p655_p0 = pneg %p654_p13 }
  0x19   : > { %p661_p5 = por %p660_p4, %p659_p3 }
  0x1b   : > { %p662_p6 = pnand %p661_p5, %p655_p0 }
  0x1d   : > { %665 = shalt.err (!%p662_p6)
}
  0x1e   : > { %s666_s18 = scalar_lea.vmem %s839_s4, 1024  ;;  %s751_s19 = smov [#allocation2]  }
  0x1f   : > { %p667_p8 = scmp.ne.s32.totalorder %s839_s4, %s666_s18  ;;  %s671_s21 = sshll.u32 %s751_s19, 4  ;;  %s672_s21 = int_to_ptr.vmem [resolvable:$false] %s671_s21 }
  0x20   : > { %s673_s25 = scalar_lea.vmem %s672_s21, 2048  ;;  %p674_p9 = scmp.lt.s32.totalorder %s839_s4, %s672_s21 }
  0x21   : > { %p669_p11 = pnand %p667_p8, %p653_p12  ;;  %p675_p1 = scmp.lt.s32.totalorder %s673_s25, %s666_s18 }
  0x23   : > { %p670_p13 = pneg %p669_p11  ;;  %p676_p2 = por %p675_p1, %p674_p9 }
  0x25   : > { %p677_p3 = pnand %p676_p2, %p670_p13 }
  0x27   : > { %680 = shalt.err (!%p677_p3)
}
  0x28   : > { %s752_s27 = smov 128   ;;  %s753_s28 = smov 64  }
  0x29   : > { %s754_s30 = smov 4   ;;  %p534_p0 = scmp.ge.s32.totalorder %s749_s15, 1 }
  0x2a   : > { %598 = dma.hbm_to_vmem [thread:$0]  (!%p843_p10), %s837_s29, 1024, %s839_s4, %s140_s6, %s752_s27, %s753_s28, %s754_s30  }
  0x2b   : > { %p175_p9 = scmp.lt.s32.totalorder %s749_s15, 3  ;;  %s532_s7 = sshll.u32 %s828_s24, 2 }
  0x2c   : > { %s887_s11 = scalar_lea.hbm %s966_s2, %s531_s26  ;;  %s163_s12 = scalar_lea.vmem [#allocation4], %s532_s7 }
  0x2d   : > { %p878_p4 = pnand %p534_p0, %p175_p9  ;;  %s170_s18 = sshll.u32 %s163_s12, 4  ;;  %s171_s18 = int_to_ptr.vmem [resolvable:$true] %s170_s18 }
  0x2e   : > { %s160_s29 = scalar_lea.sflag [#allocation5], %s828_s24  ;;  %s681_s4 = scalar_lea.hbm %s887_s11, 64 }
  0x2f   : > { %s973_s8 = scalar_select %p878_p4, 1, 0 }
  0x30   : > { %p682_p5 = scmp.ne.s32.totalorder %s887_s11, %s681_s4  ;;  %s686_s19 = scalar_lea.hbm %s966_s2, 128 }
  0x31   : > { %p687_p11 = scmp.lt.u32.totalorder %s887_s11, %s966_s2  ;;  %p688_p13 = scmp.lt.u32.totalorder %s686_s19, %s681_s4 }
  0x32   : > { %p684_p6 = pnand %p682_p5, %p653_p12  ;;  %p690_p2 = scmp.lt.u32.totalorder %s681_s4, %s887_s11 }
  0x33   : > { %p689_p1 = por %p688_p13, %p687_p11 }
  0x34   : > { %p685_p8 = pneg %p684_p6 }
  0x35   : > { %p691_p3 = por %p690_p2, %p689_p1 }
  0x37   : > { %p692_p0 = pnand %p691_p3, %p685_p8 }
  0x39   : > { %695 = shalt.err (!%p692_p0)
}
  0x3a   : > { %s696_s24 = scalar_lea.vmem %s171_s18, 64  ;;  %s755_s25 = smov [#allocation4]  }
  0x3b   : > { %p697_p9 = scmp.ne.s32.totalorder %s171_s18, %s696_s24  ;;  %s701_s27 = sshll.u32 %s755_s25, 4  ;;  %s702_s27 = int_to_ptr.vmem [resolvable:$false] %s701_s27 }
  0x3c   : > { %s703_s28 = scalar_lea.vmem %s702_s27, 128  ;;  %p704_p7 = scmp.lt.s32.totalorder %s171_s18, %s702_s27 }
  0x3d   : > { %p699_p5 = pnand %p697_p9, %p653_p12  ;;  %p705_p4 = scmp.lt.s32.totalorder %s703_s28, %s696_s24 }
  0x3f   : > { %p700_p6 = pneg %p699_p5  ;;  %p706_p11 = por %p705_p4, %p704_p7 }
  0x41   : > { %p707_p13 = pnand %p706_p11, %p700_p6 }
  0x43   : > { %710 = shalt.err (!%p707_p13)
}
  0x44   : > { %601 = dma.hbm_to_vmem [thread:$0]  (!%p843_p10), %s887_s11, 64, %s171_s18, %s160_s29  }
  0x45   : > { %p974_p8 = scmp.ne.s32.totalorder %s973_s8, 0 }
  0x46   : > { %s912_s30 = sand.u32 (!%p974_p8), 1, %s741_s13   ;;  %p975_p7 = scmp.ne.s32.totalorder (!%p974_p8), %s970_s22, 0 }
  0x47   : > { %179 = sbr.rel (%p974_p8) target bundleno = 401 (0x191), region = 32  ;;  %s535_s7 = sshll.u32 (!%p974_p8), %s912_s30, 6 }
  0x48   : > { %s182_s9 = scalar_lea.sflag (!%p974_p8), [#allocation3], %s912_s30  ;;  %s916_s10 = scalar_lea.vmem (!%p974_p8), [#allocation2], %s535_s7 }
  0x4e   : > { %728 = dma.done.wait (%p975_p7), %s182_s9, 1024  }
  0x4f   : > { %730 = vsyncadd (%p975_p7), %s182_s9, 4294966272  ;;  %s536_s5 = sshll.u32 %s912_s30, 2  ;;  %s191_s8 = scalar_lea.sflag [#allocation5], %s912_s30 }
  0x50   : > { %s924_s11 = scalar_lea.vmem [#allocation4], %s536_s5 }
  0x51   : > { %732 = dma.done.wait (%p975_p7), %s191_s8, 64  }
  0x52   : > { %734 = vsyncadd (%p975_p7), %s191_s8, 4294967232  ;;  %v756_v0 = vmov 0.0   ;;  %vm757_vm0 = vmmov 0   ;;  %v640_v1 = vld [vmem:[%s916_s10] sm:$0xff]   ;;  %v641_v2 = vld [vmem:[%s916_s10 + $0x8] sm:$0xff]   ;;  %v365_v38 = vlaneseq  ;;  %s537_s18 = sshll.u32 %s912_s30, 3 }
  0x53   : > { %571 = vmatprep.subr.bf16.mxu0 %v756_v0  ;;  %587 = vmatprep.mubr.msk.bf16.mxu0 %vm757_vm0, %v756_v0  ;;  %v642_v3 = vld [vmem:[%s916_s10 + $0x10] sm:$0xff]   ;;  %v643_v4 = vld [vmem:[%s916_s10 + $0x18] sm:$0xff]   ;;  %v644_v5 = vld [vmem:[%s916_s10 + $0x20] sm:$0xff]   ;;  %s220_s29 = scalar_lea.vmem [#allocation6], %s537_s18  ;;  %p976_p10 = scmp.ne.s32.totalorder %s971_s23, 0 }
  0x54   : > { %572 = vmatpush3.bf16.msra.mxu0 %v640_v1  ;;  %v645_v6 = vld [vmem:[%s916_s10 + $0x28] sm:$0xff]   ;;  %v646_v7 = vld [vmem:[%s916_s10 + $0x30] sm:$0xff]   ;;  %v647_v8 = vld [vmem:[%s916_s10 + $0x38] sm:$0xff]   ;;  %v366_v39 = vshrl.u32 %v365_v38, 7  ;;  %s552_s4 = sshll.u32 (%p976_p10), %s797_s16, 2 }
  0x55   : > { %573 = vmatprep.subr.bf16.mxu0 %v756_v0  ;;  %v648_v9 = vld [vmem:[%s964_s0] sm:$0xff]   ;;  %s398_s19 = scalar_lea.vmem (%p976_p10), %s967_s3, %s552_s4 }
  0x56   : > { %v538_v10 = vld [vmem:[%s924_s11] ss:$0 sm:$0xff]  ;;  %v361_v40 = vld [vmem:[%s924_s11 + $0x1] sm:$0x1]  ;;  %v367_v41 = vsub.s32 0, %v366_v39 }
  0x57   : > { %v548_v45 = vld [vmem:[%s924_s11 + $0x2] ss:$0 sm:$0xff] }
  0x58   : > { %574 = vmatpush3.bf16.msra.mxu0 %v641_v2 }
  0x59   : > { %575 = vmatprep.subr.bf16.mxu0 %v756_v0 }
  0x5c   : > { %576 = vmatpush3.bf16.msra.mxu0 %v642_v3 }
  0x5d   : > { %577 = vmatprep.subr.bf16.mxu0 %v756_v0 }
  0x60   : > { %578 = vmatpush3.bf16.msra.mxu0 %v643_v4 }
  0x61   : > { %579 = vmatprep.subr.bf16.mxu0 %v756_v0 }
  0x64   : > { %580 = vmatpush3.bf16.msra.mxu0 %v644_v5 }
  0x65   : > { %581 = vmatprep.subr.bf16.mxu0 %v756_v0 }
  0x68   : > { %582 = vmatpush3.bf16.msra.mxu0 %v645_v6 }
  0x69   : > { %583 = vmatprep.subr.bf16.mxu0 %v756_v0 }
  0x6c   : > { %584 = vmatpush3.bf16.msra.mxu0 %v646_v7 }
  0x6d   : > { %585 = vmatprep.subr.bf16.mxu0 %v756_v0 }
  0x70   : > { %586 = vmatpush3.bf16.msra.mxu0 %v647_v8 }
  0x73   : > { %588 = vmatmul.mubr.bf16.vlgmr.msra.gmra.mrb[0].mxu0 %v648_v9 }
 0x146   : > { %v333_v11 = vpop.f32.mrb[0].mxu0 }
 0x147   : > { %v589_v12 = vpop.f32.mrb[1].mxu0  ;;  %v334_v14 = vadd.f32 %v538_v10, %v333_v11 }
 0x148   : > { %v336_v13 = vpop.f32.mrb[2].mxu0 }
 0x149   : > { %v337_v15 = vadd.f32 %v538_v10, %v336_v13  ;;  %v590_v16 = vpop.f32.mrb[3].mxu0 }
 0x14b   : > { %v340_v17 = vadd.f32 %v337_v15, %v334_v14 }
 0x14d   : > { %v341_v18 = vrot.slane %v340_v17, 4 }
 0x14f   : > { %v342_v19 = vadd.f32 %v341_v18, %v340_v17 }
 0x151   : > { %v343_v20 = vrot.slane %v342_v19, 2 }
 0x153   : > { %v344_v21 = vadd.f32 %v343_v20, %v342_v19 }
 0x155   : > { %v345_v22 = vrot.slane %v344_v21, 1 }
 0x157   : > { %v346_v23 = vadd.f32 %v345_v22, %v344_v21 }
 0x159   : > { %v348_v24 = vmul.f32 0.0625, %v346_v23 }
 0x15b   : > { %v349_v25 = vsub.f32 %v334_v14, %v348_v24  ;;  %v350_v26 = vsub.f32 %v337_v15, %v348_v24 }
 0x15d   : > { %v351_v27 = vmul.f32 %v349_v25, %v349_v25  ;;  %v352_v28 = vmul.f32 %v350_v26, %v350_v26 }
 0x15f   : > { %v353_v29 = vadd.f32 %v352_v28, %v351_v27 }
 0x161   : > { %v354_v30 = vrot.slane %v353_v29, 4 }
 0x163   : > { %v355_v31 = vadd.f32 %v354_v30, %v353_v29 }
 0x165   : > { %v356_v32 = vrot.slane %v355_v31, 2 }
 0x167   : > { %v357_v33 = vadd.f32 %v356_v32, %v355_v31 }
 0x169   : > { %v358_v34 = vrot.slane %v357_v33, 1 }
 0x16b   : > { %v359_v35 = vadd.f32 %v358_v34, %v357_v33 }
 0x16d   : > { %v360_v36 = vmul.f32 0.0625, %v359_v35 }
 0x16f   : > { %v362_v37 = vadd.f32 1e-05, %v360_v36 }
 0x171   : > { %649 = vrsqrt.f32 %v362_v37 }
 0x17b   : > { %v650_v42 = vpop.eup %649 }
 0x17c   : > { %v364_v43 = vmul.f32 %v650_v42, %v361_v40 }
 0x17e   : > { %v368_v44 = vrot.slane %v364_v43, %v367_v41 }
 0x180   : > { %v369_v46 = vmul.f32 %v368_v44, %v349_v25  ;;  %v370_v47 = vmul.f32 %v368_v44, %v350_v26 }
 0x182   : > { %v376_v48 = vadd.f32 %v548_v45, %v369_v46  ;;  %v377_v49 = vadd.f32 %v548_v45, %v370_v47  ;;  %396 = sbr.rel (!%p976_p10) target bundleno = 401 (0x191), region = 44 }
 0x184   : > { %v378_v50 = vmax.f32 %v376_v48, 0.0  ;;  %v379_v51 = vmax.f32 %v377_v49, 0.0 }
 0x186   : > { %v560_v52 = vpack.c.bf16 %v379_v51, %v378_v50 }
 0x188   : > { %561 = vst [vmem:[%s220_s29] sm:$0xff] %v560_v52  }
 0x18f   : > { %v414_v53 = vld [vmem:[%s220_s29] sm:$0xf]  ;;  %v416_v54 = vld [vmem:[%s220_s29 + $0x4] sm:$0xf] }
 0x190   : > { %415 = vst [vmem:[%s398_s19] sm:$0xf] %v414_v53  ;;  %417 = vst [vmem:[%s398_s19 + $0x8] sm:$0xf] %v416_v54 }
 0x191 PF: > { %p16_p12 = scmp.ge.s32.totalorder %s800_s17, 4   ;;  %s977_s12 = smov %s741_s13 }
 0x192   : > { %s978_s13 = smov %s745_s14  ;;  %s979_s14 = smov %s810_s20 }
 0x193   : > { %s980_s15 = smov %s800_s17  ;;  %18 = sbr.rel (!%p16_p12) target bundleno = 5 (0x5), region = 126 }
 0x19a   :  { %454 = vsyncpa [#allocation3], 1 }
 0x19b   :  { %456 = vsyncpa [#allocation3 + $0x1], 1 }
 0x19c   :  { %457 = vsyncpa [#allocation5], 1 }
 0x19d   :  { %459 = vsyncpa [#allocation5 + $0x1], 1 }

// kernel: _lambda_.4
= control target key start
LH: loop header
LB: loop body
LE: loop exit
PB: predicated region body
PF: predicated region fallthrough
CT: control target
= control target key end

     0   :  { %8 = vsyncpa [#allocation3], 0  ;;  %s1051_s0 = inlined_call_operand.vmem [shape: bf16[16,256], index: 0, kind: input, shape index: {}]   ;;  %s1052_s1 = inlined_call_operand.hbm [shape: bf16[256,256], index: 1, kind: input, shape index: {}]   ;;  %s1053_s2 = inlined_call_operand.hbm [shape: f32[3,256], index: 2, kind: input, shape index: {}]   ;;  %s1054_s3 = inlined_call_operand.vmem [shape: bf16[16,256], index: 3, kind: output, shape index: {}]  }
   0x1   :  { %10 = vsyncpa [#allocation3 + $0x1], 0 }
   0x2   :  { %11 = vsyncpa [#allocation5], 0 }
   0x3   :  { %13 = vsyncpa [#allocation5 + $0x1], 0  ;;  %s854_s12 = smov 0   ;;  %s856_s13 = smov 0  }
   0x4   :  { %s858_s14 = smov 0   ;;  %s860_s15 = smov 0  }
   0x5 LB: > { %s873_s16 = sadd.s32 4294967295, %s827_s15   ;;  %s876_s17 = sadd.s32 1, %s827_s15   ;;  %s827_s15 = sphi %s860_s15, %s1067_s15   ;;  %s823_s14 = sphi %s858_s14, %s1066_s14   ;;  %s819_s13 = sphi %s856_s13, %s1065_s13   ;;  %s815_s12 = sphi %s854_s12, %s1064_s12  }
   0x6   : > { %s44_s18 = ssub.s32 %s827_s15, %s876_s17  ;;  %s47_s19 = sadd.s32 1, %s823_s14 }
   0x7   : > { %p45_p0 = scmp.eq.s32.totalorder %s44_s18, 0  ;;  %p54_p1 = scmp.ne.s32.totalorder %s823_s14, %s819_s13 }
   0x8   : > { %p55_p2 = scmp.eq.s32.totalorder %s827_s15, 0  ;;  %p60_p3 = scmp.ne.s32.totalorder %s819_s13, %s815_s12 }
   0x9   : > { %s886_s20 = scalar_select %p45_p0, %s823_s14, %s47_s19  }
   0xa   : > { %p888_p4 = por %p55_p2, %p54_p1  ;;  %p61_p5 = scmp.eq.s32.totalorder %s873_s16, 0 }
   0xb   : > { %p110_p6 = scmp.eq.s32.totalorder %s873_s16, 1  ;;  %p672_p8 = scmp.lt.s32.totalorder %s827_s15, 2 }
   0xc   : > { %p894_p7 = por %p61_p5, %p60_p3  ;;  %s904_s24 = sand.u32 1, %s823_s14  }
   0xd   : > { %p899_p9 = por %p110_p6, %p54_p1  ;;  %s598_s25 = sshll.u32 %s904_s24, 7 }
   0xe   : > { %s1057_s22 = scalar_select %p894_p7, 1, 0 }
   0xf   : > { %s1058_s23 = scalar_select %p899_p9, 1, 0 }
  0x10   : > { %s599_s26 = sshll.u32 %s827_s15, 6  ;;  %s143_s30 = scalar_lea.vmem [#allocation2], %s598_s25 }
  0x11   : > { %s913_s29 = scalar_lea.hbm %s1052_s1, %s599_s26  ;;  %s149_s4 = sshll.u32 %s143_s30, 4  ;;  %s915_s4 = int_to_ptr.vmem [resolvable:$true] %s149_s4 }
  0x12   : > { %p919_p10 = pnand %p672_p8, %p888_p4  ;;  %s140_s6 = scalar_lea.sflag [#allocation3], %s904_s24 }
  0x13   : > { %s729_s7 = scalar_lea.hbm %s913_s29, 2048  ;;  %s734_s10 = scalar_lea.hbm %s1052_s1, 4096 }
  0x14   : > { %p730_p11 = scmp.ne.s32.totalorder %s913_s29, %s729_s7  ;;  %p731_p12 = pneg %p919_p10 }
  0x15   : > { %p735_p1 = scmp.lt.u32.totalorder %s913_s29, %s1052_s1  ;;  %p736_p2 = scmp.lt.u32.totalorder %s734_s10, %s729_s7 }
  0x16   : > { %p732_p13 = pnand %p731_p12, %p730_p11  ;;  %p738_p4 = scmp.lt.u32.totalorder %s729_s7, %s913_s29 }
  0x17   : > { %p737_p3 = por %p736_p2, %p735_p1 }
  0x18   : > { %p733_p0 = pneg %p732_p13 }
  0x19   : > { %p739_p5 = por %p738_p4, %p737_p3 }
  0x1b   : > { %p740_p6 = pnand %p739_p5, %p733_p0 }
  0x1d   : > { %743 = shalt.err (!%p740_p6)
}
  0x1e   : > { %s744_s18 = scalar_lea.vmem %s915_s4, 2048  ;;  %s829_s19 = smov [#allocation2]  }
  0x1f   : > { %p745_p8 = scmp.ne.s32.totalorder %s915_s4, %s744_s18  ;;  %s749_s21 = sshll.u32 %s829_s19, 4  ;;  %s750_s21 = int_to_ptr.vmem [resolvable:$false] %s749_s21 }
  0x20   : > { %s751_s25 = scalar_lea.vmem %s750_s21, 4096  ;;  %p752_p9 = scmp.lt.s32.totalorder %s915_s4, %s750_s21 }
  0x21   : > { %p747_p11 = pnand %p745_p8, %p731_p12  ;;  %p753_p1 = scmp.lt.s32.totalorder %s751_s25, %s744_s18 }
  0x23   : > { %p748_p13 = pneg %p747_p11  ;;  %p754_p2 = por %p753_p1, %p752_p9 }
  0x25   : > { %p755_p3 = pnand %p754_p2, %p748_p13 }
  0x27   : > { %758 = shalt.err (!%p755_p3)
}
  0x28   : > { %s830_s27 = smov 128   ;;  %s831_s28 = smov 64  }
  0x29   : > { %s832_s30 = smov 4   ;;  %p602_p0 = scmp.ge.s32.totalorder %s827_s15, 1 }
  0x2a   : > { %668 = dma.hbm_to_vmem [thread:$0]  (!%p919_p10), %s913_s29, 2048, %s915_s4, %s140_s6, %s830_s27, %s831_s28, %s832_s30  }
  0x2b   : > { %p175_p9 = scmp.lt.s32.totalorder %s827_s15, 3  ;;  %s600_s7 = sshll.u32 %s904_s24, 2 }
  0x2c   : > { %s963_s11 = scalar_lea.hbm %s1053_s2, %s599_s26  ;;  %s163_s12 = scalar_lea.vmem [#allocation4], %s600_s7 }
  0x2d   : > { %p954_p4 = pnand %p602_p0, %p175_p9  ;;  %s170_s18 = sshll.u32 %s163_s12, 4  ;;  %s171_s18 = int_to_ptr.vmem [resolvable:$true] %s170_s18 }
  0x2e   : > { %s160_s29 = scalar_lea.sflag [#allocation5], %s904_s24  ;;  %s759_s4 = scalar_lea.hbm %s963_s11, 64 }
  0x2f   : > { %s1060_s8 = scalar_select %p954_p4, 1, 0 }
  0x30   : > { %p760_p5 = scmp.ne.s32.totalorder %s963_s11, %s759_s4  ;;  %s764_s19 = scalar_lea.hbm %s1053_s2, 128 }
  0x31   : > { %p765_p11 = scmp.lt.u32.totalorder %s963_s11, %s1053_s2  ;;  %p766_p13 = scmp.lt.u32.totalorder %s764_s19, %s759_s4 }
  0x32   : > { %p762_p6 = pnand %p760_p5, %p731_p12  ;;  %p768_p2 = scmp.lt.u32.totalorder %s759_s4, %s963_s11 }
  0x33   : > { %p767_p1 = por %p766_p13, %p765_p11 }
  0x34   : > { %p763_p8 = pneg %p762_p6 }
  0x35   : > { %p769_p3 = por %p768_p2, %p767_p1 }
  0x37   : > { %p770_p0 = pnand %p769_p3, %p763_p8 }
  0x39   : > { %773 = shalt.err (!%p770_p0)
}
  0x3a   : > { %s774_s24 = scalar_lea.vmem %s171_s18, 64  ;;  %s833_s25 = smov [#allocation4]  }
  0x3b   : > { %p775_p9 = scmp.ne.s32.totalorder %s171_s18, %s774_s24  ;;  %s779_s27 = sshll.u32 %s833_s25, 4  ;;  %s780_s27 = int_to_ptr.vmem [resolvable:$false] %s779_s27 }
  0x3c   : > { %s781_s28 = scalar_lea.vmem %s780_s27, 128  ;;  %p782_p7 = scmp.lt.s32.totalorder %s171_s18, %s780_s27 }
  0x3d   : > { %p777_p5 = pnand %p775_p9, %p731_p12  ;;  %p783_p4 = scmp.lt.s32.totalorder %s781_s28, %s774_s24 }
  0x3f   : > { %p778_p6 = pneg %p777_p5  ;;  %p784_p11 = por %p783_p4, %p782_p7 }
  0x41   : > { %p785_p13 = pnand %p784_p11, %p778_p6 }
  0x43   : > { %788 = shalt.err (!%p785_p13)
}
  0x44   : > { %671 = dma.hbm_to_vmem [thread:$0]  (!%p919_p10), %s963_s11, 64, %s171_s18, %s160_s29  }
  0x45   : > { %p1061_p8 = scmp.ne.s32.totalorder %s1060_s8, 0 }
  0x46   : > { %s988_s30 = sand.u32 (!%p1061_p8), 1, %s819_s13   ;;  %p1062_p7 = scmp.ne.s32.totalorder (!%p1061_p8), %s1057_s22, 0 }
  0x47   : > { %179 = sbr.rel (%p1061_p8) target bundleno = 404 (0x194), region = 32  ;;  %s603_s7 = sshll.u32 (!%p1061_p8), %s988_s30, 7 }
  0x48   : > { %s182_s9 = scalar_lea.sflag (!%p1061_p8), [#allocation3], %s988_s30  ;;  %s992_s10 = scalar_lea.vmem (!%p1061_p8), [#allocation2], %s603_s7 }
  0x4e   : > { %806 = dma.done.wait (%p1062_p7), %s182_s9, 2048  }
  0x4f   : > { %808 = vsyncadd (%p1062_p7), %s182_s9, 4294965248  ;;  %s604_s5 = sshll.u32 %s988_s30, 2  ;;  %s191_s8 = scalar_lea.sflag [#allocation5], %s988_s30 }
  0x50   : > { %s1000_s11 = scalar_lea.vmem [#allocation4], %s604_s5 }
  0x51   : > { %810 = dma.done.wait (%p1062_p7), %s191_s8, 64  }
  0x52   : > { %812 = vsyncadd (%p1062_p7), %s191_s8, 4294967232  ;;  %v708_v0 = vld [vmem:[%s992_s10 + $0x40] sm:$0xff]   ;;  %v710_v2 = vld [vmem:[%s992_s10 + $0x48] sm:$0xff]   ;;  %v433_v48 = vlaneseq  ;;  %s605_s4 = sshll.u32 %s988_s30, 3  ;;  %p1063_p10 = scmp.ne.s32.totalorder %s1058_s23, 0 }
  0x53   : > { %v709_v1 = vld [vmem:[%s992_s10] sm:$0xff]   ;;  %639 = vmatprep.subr.bf16.mxu0 %v708_v0  ;;  %v711_v3 = vld [vmem:[%s992_s10 + $0x8] sm:$0xff]   ;;  %v712_v4 = vld [vmem:[%s992_s10 + $0x50] sm:$0xff]   ;;  %s220_s15 = scalar_lea.vmem [#allocation6], %s605_s4  ;;  %s629_s6 = sshll.u32 (%p1063_p10), %s873_s16, 2 }
  0x54   : > { %640 = vmatpush3.bf16.msra.mxu0 %v709_v1  ;;  %v713_v5 = vld [vmem:[%s992_s10 + $0x10] sm:$0xff]   ;;  %v714_v6 = vld [vmem:[%s992_s10 + $0x58] sm:$0xff]   ;;  %v716_v8 = vld [vmem:[%s992_s10 + $0x60] sm:$0xff]   ;;  %v434_v49 = vshrl.u32 %v433_v48, 7  ;;  %s466_s21 = scalar_lea.vmem (%p1063_p10), %s1054_s3, %s629_s6 }
  0x55   : > { %641 = vmatprep.subr.bf16.mxu0 %v710_v2  ;;  %v715_v7 = vld [vmem:[%s992_s10 + $0x18] sm:$0xff]   ;;  %v717_v9 = vld [vmem:[%s992_s10 + $0x20] sm:$0xff]   ;;  %v718_v10 = vld [vmem:[%s992_s10 + $0x68] sm:$0xff]  }
  0x56   : > { %v726_v11 = vld [vmem:[%s1051_s0 + $0x4] ss:$8 sps:$4 sm:$0xff]   ;;  %v720_v13 = vld [vmem:[%s992_s10 + $0x70] sm:$0xff]   ;;  %v722_v15 = vld [vmem:[%s992_s10 + $0x78] sm:$0xff]   ;;  %v435_v51 = vsub.s32 0, %v434_v49 }
  0x57   : > { %v719_v12 = vld [vmem:[%s992_s10 + $0x28] sm:$0xff]   ;;  %399 = vmatprep.mubr.bf16.mxu0 %v726_v11  ;;  %v721_v14 = vld [vmem:[%s992_s10 + $0x30] sm:$0xff]   ;;  %v723_v16 = vld [vmem:[%s992_s10 + $0x38] sm:$0xff]  }
  0x58   : > { %642 = vmatpush3.bf16.msra.mxu0 %v711_v3  ;;  %v724_v17 = vld [vmem:[%s1051_s0] ss:$8 sps:$4 sm:$0xff]  }
  0x59   : > { %643 = vmatprep.subr.bf16.mxu0 %v712_v4  ;;  %v606_v22 = vld [vmem:[%s1000_s11] ss:$0 sm:$0xff]  ;;  %v429_v50 = vld [vmem:[%s1000_s11 + $0x1] sm:$0x1]  ;;  %v625_v55 = vld [vmem:[%s1000_s11 + $0x2] ss:$0 sm:$0xff] }
  0x5c   : > { %644 = vmatpush3.bf16.msra.mxu0 %v713_v5 }
  0x5d   : > { %645 = vmatprep.subr.bf16.mxu0 %v714_v6 }
  0x60   : > { %646 = vmatpush3.bf16.msra.mxu0 %v715_v7 }
  0x61   : > { %647 = vmatprep.subr.bf16.mxu0 %v716_v8 }
  0x64   : > { %648 = vmatpush3.bf16.msra.mxu0 %v717_v9 }
  0x65   : > { %649 = vmatprep.subr.bf16.mxu0 %v718_v10 }
  0x68   : > { %650 = vmatpush3.bf16.msra.mxu0 %v719_v12 }
  0x69   : > { %651 = vmatprep.subr.bf16.mxu0 %v720_v13 }
  0x6c   : > { %652 = vmatpush3.bf16.msra.mxu0 %v721_v14 }
  0x6d   : > { %653 = vmatprep.subr.bf16.mxu0 %v722_v15 }
  0x70   : > { %654 = vmatpush3.bf16.msra.mxu0 %v723_v16 }
  0x73   : > { %400 = vmatmul.mubr.bf16.vlgmr.msra.gmra.mrb[0].mxu0 %v724_v17 }
 0x146   : > { %v655_v18 = vpop.f32.mrb[0].mxu0 }
 0x147   : > { %v656_v19 = vpop.f32.mrb[1].mxu0 }
 0x148   : > { %v657_v20 = vadd.f32 %v656_v19, %v655_v18  ;;  %v658_v21 = vpop.f32.mrb[2].mxu0 }
 0x149   : > { %v659_v23 = vpop.f32.mrb[3].mxu0 }
 0x14a   : > { %v660_v24 = vadd.f32 %v659_v23, %v658_v21  ;;  %v402_v25 = vadd.f32 %v657_v20, %v606_v22 }
 0x14c   : > { %v405_v26 = vadd.f32 %v660_v24, %v606_v22 }
 0x14e   : > { %v408_v27 = vadd.f32 %v405_v26, %v402_v25 }
 0x150   : > { %v409_v28 = vrot.slane %v408_v27, 4 }
 0x152   : > { %v410_v29 = vadd.f32 %v409_v28, %v408_v27 }
 0x154   : > { %v411_v30 = vrot.slane %v410_v29, 2 }
 0x156   : > { %v412_v31 = vadd.f32 %v411_v30, %v410_v29 }
 0x158   : > { %v413_v32 = vrot.slane %v412_v31, 1 }
 0x15a   : > { %v414_v33 = vadd.f32 %v413_v32, %v412_v31 }
 0x15c   : > { %v416_v34 = vmul.f32 0.0625, %v414_v33 }
 0x15e   : > { %v417_v35 = vsub.f32 %v402_v25, %v416_v34  ;;  %v418_v36 = vsub.f32 %v405_v26, %v416_v34 }
 0x160   : > { %v419_v37 = vmul.f32 %v417_v35, %v417_v35  ;;  %v420_v38 = vmul.f32 %v418_v36, %v418_v36 }
 0x162   : > { %v421_v39 = vadd.f32 %v420_v38, %v419_v37 }
 0x164   : > { %v422_v40 = vrot.slane %v421_v39, 4 }
 0x166   : > { %v423_v41 = vadd.f32 %v422_v40, %v421_v39 }
 0x168   : > { %v424_v42 = vrot.slane %v423_v41, 2 }
 0x16a   : > { %v425_v43 = vadd.f32 %v424_v42, %v423_v41 }
 0x16c   : > { %v426_v44 = vrot.slane %v425_v43, 1 }
 0x16e   : > { %v427_v45 = vadd.f32 %v426_v44, %v425_v43 }
 0x170   : > { %v428_v46 = vmul.f32 0.0625, %v427_v45 }
 0x172   : > { %v430_v47 = vadd.f32 1e-05, %v428_v46 }
 0x174   : > { %727 = vrsqrt.f32 %v430_v47 }
 0x17e   : > { %v728_v52 = vpop.eup %727 }
 0x17f   : > { %v432_v53 = vmul.f32 %v728_v52, %v429_v50 }
 0x181   : > { %v436_v54 = vrot.slane %v432_v53, %v435_v51 }
 0x183   : > { %v437_v56 = vmul.f32 %v436_v54, %v417_v35  ;;  %v438_v57 = vmul.f32 %v436_v54, %v418_v36 }
 0x185   : > { %v444_v58 = vadd.f32 %v625_v55, %v437_v56  ;;  %v445_v59 = vadd.f32 %v625_v55, %v438_v57  ;;  %464 = sbr.rel (!%p1063_p10) target bundleno = 404 (0x194), region = 44 }
 0x187   : > { %v446_v60 = vmax.f32 %v444_v58, 0.0  ;;  %v447_v61 = vmax.f32 %v445_v59, 0.0 }
 0x189   : > { %v637_v62 = vpack.c.bf16 %v447_v61, %v446_v60 }
 0x18b   : > { %638 = vst [vmem:[%s220_s15] sm:$0xff] %v637_v62  }
 0x192   : > { %v482_v63 = vld [vmem:[%s220_s15] sm:$0xf]  ;;  %v484_v0 = vld [vmem:[%s220_s15 + $0x4] sm:$0xf] }
 0x193   : > { %483 = vst [vmem:[%s466_s21] sm:$0xf] %v482_v63  ;;  %485 = vst [vmem:[%s466_s21 + $0x8] sm:$0xf] %v484_v0 }
 0x194 PF: > { %p16_p12 = scmp.ge.s32.totalorder %s876_s17, 4   ;;  %s1064_s12 = smov %s819_s13 }
 0x195   : > { %s1065_s13 = smov %s823_s14  ;;  %s1066_s14 = smov %s886_s20 }
 0x196   : > { %s1067_s15 = smov %s876_s17  ;;  %18 = sbr.rel (!%p16_p12) target bundleno = 5 (0x5), region = 126 }
 0x19d   :  { %522 = vsyncpa [#allocation3], 1 }
 0x19e   :  { %524 = vsyncpa [#allocation3 + $0x1], 1 }
 0x19f   :  { %525 = vsyncpa [#allocation5], 1 }
 0x1a0   :  { %527 = vsyncpa [#allocation5 + $0x1], 1 }

// kernel: _lambda_.5
= control target key start
LH: loop header
LB: loop body
LE: loop exit
PB: predicated region body
PF: predicated region fallthrough
CT: control target
= control target key end

     0   :  { %8 = vsyncpa [#allocation4], 0  ;;  %s1091_s0 = inlined_call_operand.vmem [shape: bf16[16,256], index: 0, kind: input, shape index: {}]   ;;  %s1092_s1 = inlined_call_operand.vmem [shape: bf16[256,256], index: 1, kind: input, shape index: {}]   ;;  %s1093_s2 = inlined_call_operand.vmem [shape: f32[3,256], index: 2, kind: input, shape index: {}]   ;;  %s1094_s3 = inlined_call_operand.hbm [shape: f32[16,256], index: 3, kind: output, shape index: {}]  }
   0x1   :  { %10 = vsyncpa [#allocation4 + $0x1], 0  ;;  %s877_s12 = smov 0   ;;  %s879_s13 = smov 0  }
   0x2   :  { %s881_s14 = smov 0   ;;  %s883_s15 = smov 0  }
   0x3 LB: > { %s898_s16 = sadd.s32 4294967295, %s851_s15   ;;  %s671_s17 = sadd.s32 4294967294, %s851_s15   ;;  %s851_s15 = sphi %s883_s15, %s1100_s15   ;;  %s847_s14 = sphi %s881_s14, %s1099_s14   ;;  %s843_s13 = sphi %s879_s13, %s1098_s13   ;;  %s839_s12 = sphi %s877_s12, %s1097_s12  }
   0x4   : > { %s902_s18 = sadd.s32 1, %s851_s15   ;;  %s44_s19 = sadd.s32 1, %s847_s14 }
   0x5   : > { %s41_s20 = ssub.s32 %s851_s15, %s902_s18  ;;  %p51_p0 = scmp.ne.s32.totalorder %s847_s14, %s843_s13 }
   0x6   : > { %p42_p1 = scmp.eq.s32.totalorder %s41_s20, 0  ;;  %p52_p2 = scmp.eq.s32.totalorder %s851_s15, 0 }
   0x7   : > { %p107_p3 = scmp.eq.s32.totalorder %s898_s16, 1  ;;  %p112_p4 = scmp.ne.s32.totalorder %s843_s13, %s839_s12 }
   0x8   : > { %s914_s21 = scalar_select %p42_p1, %s847_s14, %s44_s19  }
   0x9   : > { %p53_p5 = por %p52_p2, %p51_p0  ;;  %p916_p6 = por %p107_p3, %p51_p0 }
   0xa   : > { %p113_p7 = scmp.eq.s32.totalorder %s671_s17, 1  ;;  %p673_p9 = scmp.ge.s32.totalorder %s851_s15, 2 }
   0xc   : > { %p920_p8 = por %p113_p7, %p112_p4  ;;  %132 = sbr.rel (%p673_p9) target bundleno = 44 (0x2c), region = 20 }
  0x13   : > { %135 = sbr.rel (!%p53_p5) target bundleno = 44 (0x2c), region = 24  ;;  %s137_s24 = sand.u32 (%p53_p5), 1, %s847_s14  }
  0x14   : > { %s675_s25 = sshll.u32 (%p53_p5), %s851_s15, 2  ;;  %s674_s26 = sshll.u32 (%p53_p5), %s137_s24, 7 }
  0x15   : > { %s932_s29 = scalar_lea.vmem (%p53_p5), %s1092_s1, %s675_s25  ;;  %s936_s30 = scalar_lea.vmem (%p53_p5), [#allocation2], %s674_s26 }
  0x16   : > { %v157_v0 = vld [vmem:[%s932_s29] sm:$0xf] (%p53_p5)  ;;  %v159_v1 = vld [vmem:[%s932_s29 + $0x8] sm:$0xf] (%p53_p5)  ;;  %v161_v2 = vld [vmem:[%s932_s29 + $0x10] sm:$0xf] (%p53_p5) }
  0x17   : > { %158 = vst [vmem:[%s936_s30] sm:$0xf] (%p53_p5), %v157_v0  ;;  %160 = vst [vmem:[%s936_s30 + $0x4] sm:$0xf] (%p53_p5), %v159_v1  ;;  %v163_v3 = vld [vmem:[%s932_s29 + $0x18] sm:$0xf] (%p53_p5) }
  0x18   : > { %v165_v4 = vld [vmem:[%s932_s29 + $0x20] sm:$0xf] (%p53_p5)  ;;  %162 = vst [vmem:[%s936_s30 + $0x8] sm:$0xf] (%p53_p5), %v161_v2  ;;  %164 = vst [vmem:[%s936_s30 + $0xc] sm:$0xf] (%p53_p5), %v163_v3 }
  0x19   : > { %166 = vst [vmem:[%s936_s30 + $0x10] sm:$0xf] (%p53_p5), %v165_v4  ;;  %v167_v5 = vld [vmem:[%s932_s29 + $0x28] sm:$0xf] (%p53_p5)  ;;  %v169_v6 = vld [vmem:[%s932_s29 + $0x30] sm:$0xf] (%p53_p5) }
  0x1a   : > { %v171_v7 = vld [vmem:[%s932_s29 + $0x38] sm:$0xf]  ;;  %168 = vst [vmem:[%s936_s30 + $0x14] sm:$0xf] %v167_v5  ;;  %170 = vst [vmem:[%s936_s30 + $0x18] sm:$0xf] %v169_v6 }
  0x1b   : > { %172 = vst [vmem:[%s936_s30 + $0x1c] sm:$0xf] %v171_v7  ;;  %v173_v8 = vld [vmem:[%s932_s29 + $0x40] sm:$0xf]  ;;  %v175_v9 = vld [vmem:[%s932_s29 + $0x48] sm:$0xf] }
  0x1c   : > { %v177_v10 = vld [vmem:[%s932_s29 + $0x50] sm:$0xf]  ;;  %174 = vst [vmem:[%s936_s30 + $0x20] sm:$0xf] %v173_v8  ;;  %176 = vst [vmem:[%s936_s30 + $0x24] sm:$0xf] %v175_v9 }
  0x1d   : > { %178 = vst [vmem:[%s936_s30 + $0x28] sm:$0xf] %v177_v10  ;;  %v179_v11 = vld [vmem:[%s932_s29 + $0x58] sm:$0xf]  ;;  %v181_v12 = vld [vmem:[%s932_s29 + $0x60] sm:$0xf] }
  0x1e   : > { %v183_v13 = vld [vmem:[%s932_s29 + $0x68] sm:$0xf]  ;;  %180 = vst [vmem:[%s936_s30 + $0x2c] sm:$0xf] %v179_v11  ;;  %182 = vst [vmem:[%s936_s30 + $0x30] sm:$0xf] %v181_v12 }
  0x1f   : > { %184 = vst [vmem:[%s936_s30 + $0x34] sm:$0xf] %v183_v13  ;;  %v185_v14 = vld [vmem:[%s932_s29 + $0x70] sm:$0xf]  ;;  %v187_v15 = vld [vmem:[%s932_s29 + $0x78] sm:$0xf] }
  0x20   : > { %v189_v16 = vld [vmem:[%s932_s29 + $0x80] sm:$0xf]  ;;  %186 = vst [vmem:[%s936_s30 + $0x38] sm:$0xf] %v185_v14  ;;  %188 = vst [vmem:[%s936_s30 + $0x3c] sm:$0xf] %v187_v15 }
  0x21   : > { %190 = vst [vmem:[%s936_s30 + $0x40] sm:$0xf] %v189_v16  ;;  %v191_v17 = vld [vmem:[%s932_s29 + $0x88] sm:$0xf]  ;;  %v193_v18 = vld [vmem:[%s932_s29 + $0x90] sm:$0xf] }
  0x22   : > { %v195_v19 = vld [vmem:[%s932_s29 + $0x98] sm:$0xf]  ;;  %192 = vst [vmem:[%s936_s30 + $0x44] sm:$0xf] %v191_v17  ;;  %194 = vst [vmem:[%s936_s30 + $0x48] sm:$0xf] %v193_v18 }
  0x23   : > { %196 = vst [vmem:[%s936_s30 + $0x4c] sm:$0xf] %v195_v19  ;;  %v197_v20 = vld [vmem:[%s932_s29 + $0xa0] sm:$0xf]  ;;  %v199_v21 = vld [vmem:[%s932_s29 + $0xa8] sm:$0xf] }
  0x24   : > { %v201_v22 = vld [vmem:[%s932_s29 + $0xb0] sm:$0xf]  ;;  %198 = vst [vmem:[%s936_s30 + $0x50] sm:$0xf] %v197_v20  ;;  %200 = vst [vmem:[%s936_s30 + $0x54] sm:$0xf] %v199_v21 }
  0x25   : > { %202 = vst [vmem:[%s936_s30 + $0x58] sm:$0xf] %v201_v22  ;;  %v203_v23 = vld [vmem:[%s932_s29 + $0xb8] sm:$0xf]  ;;  %v205_v24 = vld [vmem:[%s932_s29 + $0xc0] sm:$0xf] }
  0x26   : > { %v207_v25 = vld [vmem:[%s932_s29 + $0xc8] sm:$0xf]  ;;  %204 = vst [vmem:[%s936_s30 + $0x5c] sm:$0xf] %v203_v23  ;;  %206 = vst [vmem:[%s936_s30 + $0x60] sm:$0xf] %v205_v24 }
  0x27   : > { %208 = vst [vmem:[%s936_s30 + $0x64] sm:$0xf] %v207_v25  ;;  %v209_v26 = vld [vmem:[%s932_s29 + $0xd0] sm:$0xf]  ;;  %v211_v27 = vld [vmem:[%s932_s29 + $0xd8] sm:$0xf] }
  0x28   : > { %v213_v28 = vld [vmem:[%s932_s29 + $0xe0] sm:$0xf]  ;;  %210 = vst [vmem:[%s936_s30 + $0x68] sm:$0xf] %v209_v26  ;;  %212 = vst [vmem:[%s936_s30 + $0x6c] sm:$0xf] %v211_v27 }
  0x29   : > { %214 = vst [vmem:[%s936_s30 + $0x70] sm:$0xf] %v213_v28  ;;  %v215_v29 = vld [vmem:[%s932_s29 + $0xe8] sm:$0xf]  ;;  %v217_v30 = vld [vmem:[%s932_s29 + $0xf0] sm:$0xf] }
  0x2a   : > { %v219_v31 = vld [vmem:[%s932_s29 + $0xf8] sm:$0xf]  ;;  %216 = vst [vmem:[%s936_s30 + $0x74] sm:$0xf] %v215_v29  ;;  %218 = vst [vmem:[%s936_s30 + $0x78] sm:$0xf] %v217_v30 }
  0x2b   : > { %220 = vst [vmem:[%s936_s30 + $0x7c] sm:$0xf] %v219_v31 }
  0x2c PF: > { %p676_p10 = scmp.ge.s32.totalorder %s851_s15, 1  ;;  %p313_p11 = scmp.lt.s32.totalorder %s851_s15, 3 }
  0x2e   : > { %p314_p12 = pnand %p676_p10, %p313_p11 }
  0x2f   : > { %s1003_s4 = sand.u32 (!%p314_p12), 1, %s843_s13   ;;  %v786_v32 = vld [vmem:[%s1091_s0 + $0x4] ss:$8 sps:$4 sm:$0xff] (!%p314_p12)   ;;  %v784_v49 = vld [vmem:[%s1091_s0] ss:$8 sps:$4 sm:$0xff] (!%p314_p12)   ;;  %p347_p13 = scmp.lt.s32.totalorder (!%p314_p12), %s898_s16, 1  ;;  %v563_v16 = vlaneseq (!%p314_p12) }
  0x30   : > { %317 = sbr.rel (%p314_p12) target bundleno = 375 (0x177), region = 69  ;;  %s677_s5 = sshll.u32 (!%p314_p12), %s1003_s4, 7  ;;  %529 = vmatprep.mubr.bf16.mxu0 (!%p314_p12), %v786_v32 }
  0x31   : > { %s1009_s8 = scalar_lea.vmem (!%p314_p12), [#allocation2], %s677_s5  ;;  %v564_v17 = vshrl.u32 (!%p314_p12), %v563_v16, 7  ;;  %s678_s25 = sshll.u32 (!%p314_p12), %s1003_s4, 4 }
  0x32   : > { %v768_v33 = vld [vmem:[%s1009_s8 + $0x40] sm:$0xff] (!%p314_p12)   ;;  %v770_v35 = vld [vmem:[%s1009_s8 + $0x48] sm:$0xff] (!%p314_p12)   ;;  %v772_v37 = vld [vmem:[%s1009_s8 + $0x50] sm:$0xff] (!%p314_p12)   ;;  %s346_s26 = scalar_lea.vmem (!%p314_p12), [#allocation3], %s678_s25  ;;  %s701_s28 = sshll.u32 (!%p314_p12), %s898_s16, 7 }
  0x33   : > { %v769_v34 = vld [vmem:[%s1009_s8] sm:$0xff] (!%p314_p12)   ;;  %704 = vmatprep.subr.bf16.mxu0 (!%p314_p12), %v768_v33  ;;  %v771_v36 = vld [vmem:[%s1009_s8 + $0x8] sm:$0xff] (!%p314_p12)   ;;  %v773_v38 = vld [vmem:[%s1009_s8 + $0x10] sm:$0xff] (!%p314_p12)   ;;  %v565_v19 = vsub.s32 (!%p314_p12), 0, %v564_v17  ;;  %s591_s27 = sshll.u32 (!%p314_p12), %s346_s26, 4  ;;  %s1047_s5 = scalar_lea.hbm (!%p314_p12), %s1094_s3, %s701_s28  ;;  %s1042_s27 = int_to_ptr.vmem [resolvable:$true] %s591_s27 }
  0x34   : > { %705 = vmatpush3.bf16.msra.mxu0 (!%p314_p12), %v769_v34  ;;  %v774_v39 = vld [vmem:[%s1009_s8 + $0x58] sm:$0xff] (!%p314_p12)   ;;  %v776_v41 = vld [vmem:[%s1009_s8 + $0x60] sm:$0xff] (!%p314_p12)   ;;  %v778_v43 = vld [vmem:[%s1009_s8 + $0x68] sm:$0xff] (!%p314_p12)   ;;  %s579_s6 = scalar_lea.sflag (!%p314_p12), [#allocation4], %s1003_s4  ;;  %s789_s7 = scalar_lea.vmem (!%p314_p12), %s1042_s27, 256 }
  0x35   : > { %706 = vmatprep.subr.bf16.mxu0 (!%p314_p12), %v770_v35  ;;  %v775_v40 = vld [vmem:[%s1009_s8 + $0x18] sm:$0xff] (!%p314_p12)   ;;  %v777_v42 = vld [vmem:[%s1009_s8 + $0x20] sm:$0xff] (!%p314_p12)   ;;  %v779_v44 = vld [vmem:[%s1009_s8 + $0x28] sm:$0xff] (!%p314_p12)   ;;  %p790_p0 = scmp.ne.s32.totalorder (!%p314_p12), %s1042_s27, %s789_s7 }
  0x36   : > { %v780_v45 = vld [vmem:[%s1009_s8 + $0x70] sm:$0xff] (!%p314_p12)   ;;  %v782_v47 = vld [vmem:[%s1009_s8 + $0x78] sm:$0xff] (!%p314_p12)  }
  0x37   : > { %v781_v46 = vld [vmem:[%s1009_s8 + $0x30] sm:$0xff]   ;;  %v783_v48 = vld [vmem:[%s1009_s8 + $0x38] sm:$0xff]   ;;  %s348_s11 = scalar_select %p347_p13, %s898_s16, 1 }
  0x38   : > { %707 = vmatpush3.bf16.msra.mxu0 %v771_v36  ;;  %p791_p1 = pnand %p790_p0, %p916_p6  ;;  %s853_s16 = smov [#allocation3]  }
  0x39   : > { %708 = vmatprep.subr.bf16.mxu0 %v772_v37  ;;  %s679_s17 = sshll.u32 %s348_s11, 2  ;;  %s793_s8 = sshll.u32 %s853_s16, 4  ;;  %s794_s8 = int_to_ptr.vmem [resolvable:$false] %s793_s8 }
  0x3a   : > { %s1035_s24 = scalar_lea.vmem %s1093_s2, %s679_s17  ;;  %p792_p2 = pneg %p791_p1 }
  0x3b   : > { %v680_v54 = vld [vmem:[%s1035_s24] ss:$0 sm:$0xff]  ;;  %v559_v18 = vld [vmem:[%s1035_s24 + $0x1] sm:$0x1]  ;;  %v699_v23 = vld [vmem:[%s1035_s24 + $0x2] ss:$0 sm:$0xff]  ;;  %p796_p3 = scmp.lt.s32.totalorder %s1042_s27, %s794_s8 }
  0x3c   : > { %709 = vmatpush3.bf16.msra.mxu0 %v773_v38  ;;  %s795_s9 = scalar_lea.vmem %s794_s8, 512 }
  0x3d   : > { %710 = vmatprep.subr.bf16.mxu0 %v774_v39  ;;  %p797_p4 = scmp.lt.s32.totalorder %s795_s9, %s789_s7 }
  0x3f   : > { %p798_p5 = por %p797_p4, %p796_p3 }
  0x40   : > { %711 = vmatpush3.bf16.msra.mxu0 %v775_v40 }
  0x41   : > { %712 = vmatprep.subr.bf16.mxu0 %v776_v41  ;;  %p799_p7 = pnand %p798_p5, %p792_p2 }
  0x44   : > { %713 = vmatpush3.bf16.msra.mxu0 %v777_v42 }
  0x45   : > { %714 = vmatprep.subr.bf16.mxu0 %v778_v43 }
  0x48   : > { %715 = vmatpush3.bf16.msra.mxu0 %v779_v44 }
  0x49   : > { %716 = vmatprep.subr.bf16.mxu0 %v780_v45 }
  0x4c   : > { %717 = vmatpush3.bf16.msra.mxu0 %v781_v46 }
  0x4d   : > { %718 = vmatprep.subr.bf16.mxu0 %v782_v47 }
  0x50   : > { %719 = vmatpush3.bf16.msra.mxu0 %v783_v48 }
  0x53   : > { %530 = vmatmul.mubr.bf16.vlgmr.msra.gmra.mrb[0].mxu0 %v784_v49 }
 0x126   : > { %v720_v50 = vpop.f32.mrb[0].mxu0 }
 0x127   : > { %v721_v51 = vpop.f32.mrb[1].mxu0 }
 0x128   : > { %v722_v52 = vadd.f32 %v721_v51, %v720_v50  ;;  %v723_v53 = vpop.f32.mrb[2].mxu0 }
 0x129   : > { %v724_v55 = vpop.f32.mrb[3].mxu0 }
 0x12a   : > { %v725_v56 = vadd.f32 %v724_v55, %v723_v53  ;;  %v532_v57 = vadd.f32 %v722_v52, %v680_v54 }
 0x12c   : > { %v535_v58 = vadd.f32 %v725_v56, %v680_v54 }
 0x12e   : > { %v538_v59 = vadd.f32 %v535_v58, %v532_v57 }
 0x130   : > { %v539_v60 = vrot.slane %v538_v59, 4 }
 0x132   : > { %v540_v61 = vadd.f32 %v539_v60, %v538_v59 }
 0x134   : > { %v541_v62 = vrot.slane %v540_v61, 2 }
 0x136   : > { %v542_v63 = vadd.f32 %v541_v62, %v540_v61 }
 0x138   : > { %v543_v0 = vrot.slane %v542_v63, 1 }
 0x13a   : > { %v544_v1 = vadd.f32 %v543_v0, %v542_v63 }
 0x13c   : > { %v546_v2 = vmul.f32 0.0625, %v544_v1 }
 0x13e   : > { %v547_v3 = vsub.f32 %v532_v57, %v546_v2  ;;  %v548_v4 = vsub.f32 %v535_v58, %v546_v2 }
 0x140   : > { %v549_v5 = vmul.f32 %v547_v3, %v547_v3  ;;  %v550_v6 = vmul.f32 %v548_v4, %v548_v4 }
 0x142   : > { %v551_v7 = vadd.f32 %v550_v6, %v549_v5 }
 0x144   : > { %v552_v8 = vrot.slane %v551_v7, 4 }
 0x146   : > { %v553_v9 = vadd.f32 %v552_v8, %v551_v7 }
 0x148   : > { %v554_v10 = vrot.slane %v553_v9, 2 }
 0x14a   : > { %v555_v11 = vadd.f32 %v554_v10, %v553_v9 }
 0x14c   : > { %v556_v12 = vrot.slane %v555_v11, 1 }
 0x14e   : > { %v557_v13 = vadd.f32 %v556_v12, %v555_v11 }
 0x150   : > { %v558_v14 = vmul.f32 0.0625, %v557_v13 }
 0x152   : > { %v560_v15 = vadd.f32 1e-05, %v558_v14 }
 0x154   : > { %787 = vrsqrt.f32 %v560_v15 }
 0x15e   : > { %v788_v20 = vpop.eup %787 }
 0x15f   : > { %v562_v21 = vmul.f32 %v788_v20, %v559_v18 }
 0x161   : > { %v566_v22 = vrot.slane %v562_v21, %v565_v19 }
 0x163   : > { %v567_v24 = vmul.f32 %v566_v22, %v547_v3  ;;  %v568_v25 = vmul.f32 %v566_v22, %v548_v4 }
 0x165   : > { %v574_v26 = vadd.f32 %v699_v23, %v567_v24  ;;  %v575_v27 = vadd.f32 %v699_v23, %v568_v25 }
 0x167   : > { %576 = vst [vmem:[%s346_s26] sm:$0xff] %v574_v26  ;;  %577 = vst [vmem:[%s346_s26 + $0x8] sm:$0xff] %v575_v27 }
 0x168   : > { %802 = shalt.err (!%p799_p7)
}
 0x169   : > { %s803_s10 = scalar_lea.hbm %s1047_s5, 256  ;;  %s807_s19 = scalar_lea.hbm %s1094_s3, 512 }
 0x16a   : > { %p804_p10 = scmp.ne.s32.totalorder %s1047_s5, %s803_s10  ;;  %p808_p13 = scmp.lt.u32.totalorder %s1047_s5, %s1094_s3 }
 0x16b   : > { %p809_p0 = scmp.lt.u32.totalorder %s807_s19, %s803_s10  ;;  %p811_p2 = scmp.lt.u32.totalorder %s803_s10, %s1047_s5 }
 0x16c   : > { %p805_p11 = pnand %p804_p10, %p916_p6 }
 0x16d   : > { %p810_p1 = por %p809_p0, %p808_p13 }
 0x16e   : > { %p806_p12 = pneg %p805_p11 }
 0x16f   : > { %p812_p3 = por %p811_p2, %p810_p1 }
 0x171   : > { %p813_p4 = pnand %p812_p3, %p806_p12 }
 0x173   : > { %816 = shalt.err (!%p813_p4)
}
 0x174   : > { %s854_s25 = smov 128   ;;  %s855_s26 = smov 256  }
 0x175   : > { %s856_s28 = smov 8  }
 0x176   : > { %726 = dma.vmem_to_hbm [thread:$0]  (%p916_p6), %s1042_s27, 256, %s1047_s5, %s579_s6, %s854_s25, %s855_s26, %s856_s28  }
 0x177 PF: > { %s606_s29 = sand.u32 1, %s839_s12   ;;  %p729_p5 = pnand %p673_p9, %p920_p8 }
 0x178   : > { %s607_s30 = scalar_lea.sflag [#allocation4], %s606_s29 }
 0x179   : > { %834 = dma.done.wait (!%p729_p5), %s607_s30, 256  }
 0x17a   : > { %836 = vsyncadd (!%p729_p5), %s607_s30, 4294967040  ;;  %p13_p7 = scmp.ge.s32.totalorder %s902_s18, 4   ;;  %s1097_s12 = smov %s843_s13 }
 0x17b   : > { %s1098_s13 = smov %s847_s14  ;;  %s1099_s14 = smov %s914_s21 }
 0x17c   : > { %s1100_s15 = smov %s902_s18  ;;  %15 = sbr.rel (!%p13_p7) target bundleno = 3 (0x3), region = 116 }
 0x183   :  { %612 = vsyncpa [#allocation4], 1 }
 0x184   :  { %614 = vsyncpa [#allocation4 + $0x1], 1 }

</bundles_post_ra>
